<compile_context>
chip_gen: v5e
topology: v5e:2x2
jax: 0.10.0
libtpu: 0.0.40
codegen_flags: <defaults>
</compile_context>

<pallas_src>
import jax
import jax.numpy as jnp
from jax.experimental import pallas as pl
from jax.experimental.pallas import tpu as pltpu

HIDDEN = 256
LANE = 128         # lane width: output/action dim padded to a multiple of this
BATCH_ALIGN = 16   # sublane granularity covering f32 (8) and bf16 (16) tiles


def _round_up(x: int, m: int) -> int:
    return ((x + m - 1) // m) * m


def _choose_batch_tiling(B: int, max_tb: int = 1024):
    """Pick (tb, n_tiles, B_pad): minimal padding, tb multiple of BATCH_ALIGN,
    and >= 2 (even) tiles when there is enough work so the 'parallel' batch
    axis shards across both v7x TensorCores."""
    max_tb = max(_round_up(max_tb, BATCH_ALIGN), BATCH_ALIGN)
    Ba = _round_up(max(B, 1), BATCH_ALIGN)
    n_tiles = pl.cdiv(Ba, max_tb)
    if n_tiles < 2 and Ba >= 2 * BATCH_ALIGN:
        n_tiles = 2                       # keep both TensorCores busy on v7x
    elif n_tiles > 1 and n_tiles % 2 == 1:
        n_tiles += 1                      # even tile count balances the two cores
    tb = _round_up(pl.cdiv(Ba, n_tiles), BATCH_ALIGN)
    n_tiles = pl.cdiv(Ba, tb)             # drop tiles that became pure padding
    return tb, n_tiles, tb * n_tiles


def make_actor_kernel(max_action: float):
    def actor_kernel(x_ref, w1_ref, b1_ref, w2_ref, b2_ref, w3_ref, b3_ref, o_ref):
        # Layer 1: Linear(state_dim -> 256) + ReLU  (bf16 MXU inputs, f32 accum)
        x = x_ref[...].astype(jnp.bfloat16)   # no-op if the producer already emits bf16
        h1 = jnp.dot(x, w1_ref[...], preferred_element_type=jnp.float32) + b1_ref[...]
        h1 = jnp.maximum(h1, 0.0).astype(jnp.bfloat16)
        # Layer 2: Linear(256 -> 256) + ReLU
        h2 = jnp.dot(h1, w2_ref[...], preferred_element_type=jnp.float32) + b2_ref[...]
        h2 = jnp.maximum(h2, 0.0).astype(jnp.bfloat16)
        # Layer 3: Linear(256 -> action_dim_padded), tanh, scale by max_action
        h3 = jnp.dot(h2, w3_ref[...], preferred_element_type=jnp.float32) + b3_ref[...]
        o_ref[...] = (max_action * jnp.tanh(h3)).astype(o_ref.dtype)

    return actor_kernel


def actor_forward(state, params, max_action, action_dim, *,
                  max_tb=1024, out_dtype=jnp.bfloat16, keep_padded=False):
    """state: [B, state_dim] f32 or bf16.
    params: bf16 weights stored [in, out] (w3/b3 padded to 128 lanes), f32 biases [1, out].
    Returns [B, action_dim] in `out_dtype` (bf16 by default to halve writeback),
    or the padded [B_pad, 128] slab when keep_padded=True (rows >= B and lanes
    >= action_dim are garbage and must be ignored by the consumer)."""
    B, state_dim = state.shape
    a_pad = params["w3"].shape[1]                 # padded action dim (multiple of 128)

    tb, n_tiles, B_pad = _choose_batch_tiling(B, max_tb)
    if B_pad != B:
        state = jnp.pad(state, ((0, B_pad - B), (0, 0)))

    in_bytes = jnp.dtype(state.dtype).itemsize
    out_bytes = jnp.dtype(out_dtype).itemsize
    flops = 2 * B_pad * (state_dim * HIDDEN + HIDDEN * HIDDEN + HIDDEN * a_pad)
    bytes_accessed = (
        B_pad * state_dim * in_bytes
        + (params["w1"].size + params["w2"].size + params["w3"].size) * 2   # bf16 weights
        + (params["b1"].size + params["b2"].size + params["b3"].size) * 4   # f32 biases
        + B_pad * a_pad * out_bytes)
    cost = pl.CostEstimate(flops=flops,
                           transcendentals=B_pad * a_pad,                   # tanh
                           bytes_accessed=bytes_accessed)

    # Weights/biases: constant block index -> DMA'd once, VMEM-resident for the
    # whole grid.  Total resident footprint is ~0.3 MiB, far under any VMEM cap.
    resident = lambda shape: pl.BlockSpec(shape, lambda i: (0, 0))

    out = pl.pallas_call(
        make_actor_kernel(float(max_action)),
        out_shape=jax.ShapeDtypeStruct((B_pad, a_pad), out_dtype),
        grid=(n_tiles,),
        in_specs=[
            pl.BlockSpec((tb, state_dim), lambda i: (i, 0)),
            resident(params["w1"].shape),
            resident(params["b1"].shape),
            resident(params["w2"].shape),
            resident(params["b2"].shape),
            resident(params["w3"].shape),
            resident(params["b3"].shape),
        ],
        out_specs=pl.BlockSpec((tb, a_pad), lambda i: (i, 0)),
        compiler_params=pltpu.CompilerParams(
            dimension_semantics=("parallel",)),
        cost_estimate=cost,
    )(state, params["w1"], params["b1"], params["w2"], params["b2"],
      params["w3"], params["b3"])

    if keep_padded:
        return out
    return out[:B, :action_dim]


def actor_forward_steps(states, params, max_action, action_dim, **kwargs):
    """Pre-collected states [T, B, state_dim] (e.g. offline eval / replay buffer):
    folds all steps into the batch grid of ONE pallas_call, so weights are DMA'd
    into VMEM once and the per-call launch overhead is amortized over T*B rows."""
    T, B, S = states.shape
    out = actor_forward(states.reshape(T * B, S), params, max_action, action_dim,
                        **kwargs)
    return out.reshape(T, B, out.shape[-1])
    # TODO(synk): for the truly sequential per-env-step path (B~8, state depends
    # on the previous action) the remaining lever is cross-call weight pinning:
    # start the weight DMA in a prior pallas_call and return the VMEM ref +
    # semaphore as outputs consumed here (P10), instead of re-DMA'ing per step.


def init_params(key, state_dim, action_dim):
    """Deterministic init mimicking nn.Linear default (uniform +/- 1/sqrt(fan_in)).
    Weights stored as bf16 [in, out]; w3/b3 zero-padded to 128 output lanes."""
    ks = jax.random.split(key, 6)

    def linear(kw, kb, fan_in, fan_out):
        bound = 1.0 / jnp.sqrt(fan_in)
        w = jax.random.uniform(kw, (fan_in, fan_out), jnp.float32, -bound, bound)
        b = jax.random.uniform(kb, (1, fan_out), jnp.float32, -bound, bound)
        return w.astype(jnp.bfloat16), b

    w1, b1 = linear(ks[0], ks[1], state_dim, HIDDEN)
    w2, b2 = linear(ks[2], ks[3], HIDDEN, HIDDEN)
    w3, b3 = linear(ks[4], ks[5], HIDDEN, action_dim)

    a_pad = _round_up(action_dim, LANE)
    w3 = jnp.pad(w3, ((0, 0), (0, a_pad - action_dim)))
    b3 = jnp.pad(b3, ((0, 0), (0, a_pad - action_dim)))
    return {"w1": w1, "b1": b1, "w2": w2, "b2": b2, "w3": w3, "b3": b3}


def actor_reference(state, params, max_action, action_dim):
    """Pure-JAX reference with the same bf16-weights / f32-accumulation recipe."""
    x = state.astype(jnp.bfloat16)
    h1 = jnp.maximum(
        jnp.dot(x, params["w1"], preferred_element_type=jnp.float32) + params["b1"], 0.0)
    h2 = jnp.maximum(
        jnp.dot(h1.astype(jnp.bfloat16), params["w2"],
                preferred_element_type=jnp.float32) + params["b2"], 0.0)
    h3 = jnp.dot(h2.astype(jnp.bfloat16), params["w3"],
                 preferred_element_type=jnp.float32) + params["b3"]
    return (max_action * jnp.tanh(h3))[:, :action_dim]


if __name__ == "__main__":
    key = jax.random.PRNGKey(0)
    k_params, k_state = jax.random.split(key)

    batch = 8
    state_dim = 32
    action_dim = 8
    max_action = 2.0

    params = init_params(k_params, state_dim, action_dim)
    state = jax.random.normal(k_state, (batch, state_dim), dtype=jnp.float32)

    # Small single-tile (per-step RL) path.
    out = jax.block_until_ready(actor_forward(state, params, max_action, action_dim))
    ref = actor_reference(state, params, max_action, action_dim)
    assert out.shape == (batch, action_dim)
    assert jnp.allclose(out.astype(jnp.float32), ref, atol=2e-2, rtol=2e-2), \
        "mismatch vs reference (B=8)"

    # Multi-tile path (grid of 2 tiles -> exercises megacore split + row padding).
    batch2 = 40
    state2 = jax.random.normal(jax.random.PRNGKey(1), (batch2, state_dim),
                               dtype=jnp.float32)
    out2 = jax.block_until_ready(actor_forward(state2, params, max_action, action_dim))
    ref2 = actor_reference(state2, params, max_action, action_dim)
    assert out2.shape == (batch2, action_dim)
    assert jnp.allclose(out2.astype(jnp.float32), ref2, atol=2e-2, rtol=2e-2), \
        "mismatch vs reference (B=40, 2 tiles)"

    print("KERNEL_OK")
</pallas_src>

<mosaic_0001>
module attributes {stable_mosaic.version = 11 : i64} {
  func.func @actor_kernel(%arg0: i32, %arg1: memref<16x32xf32, #tpu.memory_space<vmem>>, %arg2: memref<32x256xbf16, #tpu.memory_space<vmem>>, %arg3: memref<1x256xf32, #tpu.memory_space<vmem>>, %arg4: memref<256x256xbf16, #tpu.memory_space<vmem>>, %arg5: memref<1x256xf32, #tpu.memory_space<vmem>>, %arg6: memref<256x128xbf16, #tpu.memory_space<vmem>>, %arg7: memref<1x128xf32, #tpu.memory_space<vmem>>, %arg8: memref<16x128xbf16, #tpu.memory_space<vmem>>) attributes {dimension_semantics = [#tpu.dimension_semantics<parallel>], iteration_bounds = array<i64: 1>, scalar_prefetch = 0 : i64, scratch_operands = 0 : i64, tpu.core_type = #tpu.core_type<tc>, window_params = [{transform_indices = @transform_0, window_bounds = array<i64: 16, 32>}, {pipeline_mode = #tpu.pipeline_mode<synchronous>, transform_indices = @transform_1, window_bounds = array<i64: 32, 256>}, {pipeline_mode = #tpu.pipeline_mode<synchronous>, transform_indices = @transform_2, window_bounds = array<i64: 1, 256>}, {pipeline_mode = #tpu.pipeline_mode<synchronous>, transform_indices = @transform_3, window_bounds = array<i64: 256, 256>}, {pipeline_mode = #tpu.pipeline_mode<synchronous>, transform_indices = @transform_4, window_bounds = array<i64: 1, 256>}, {pipeline_mode = #tpu.pipeline_mode<synchronous>, transform_indices = @transform_5, window_bounds = array<i64: 256, 128>}, {pipeline_mode = #tpu.pipeline_mode<synchronous>, transform_indices = @transform_6, window_bounds = array<i64: 1, 128>}, {transform_indices = @transform_7, window_bounds = array<i64: 16, 128>}]} {
    %c0 = arith.constant 0 : index
    %c0_0 = arith.constant 0 : index
    %0 = vector.load %arg1[%c0, %c0_0] : memref<16x32xf32, #tpu.memory_space<vmem>>, vector<16x32xf32>
    %1 = arith.truncf %0 : vector<16x32xf32> to vector<16x32xbf16>
    %c0_1 = arith.constant 0 : index
    %c0_2 = arith.constant 0 : index
    %2 = vector.load %arg2[%c0_1, %c0_2] : memref<32x256xbf16, #tpu.memory_space<vmem>>, vector<32x256xbf16>
    %cst = arith.constant dense<0.000000e+00> : vector<16x256xf32>
    %3 = tpu.matmul %1, %2, %cst {dimension_numbers = #tpu.dot_dimension_numbers<[1], [0], [0], [1], [0, 0, 1, 1], [], []>} : vector<16x32xbf16>, vector<32x256xbf16>, vector<16x256xf32> -> vector<16x256xf32>
    %c0_3 = arith.constant 0 : index
    %c0_4 = arith.constant 0 : index
    %4 = vector.load %arg3[%c0_3, %c0_4] : memref<1x256xf32, #tpu.memory_space<vmem>>, vector<1x256xf32>
    %5 = vector.broadcast %4 : vector<1x256xf32> to vector<16x256xf32>
    %6 = arith.addf %3, %5 : vector<16x256xf32>
    %cst_5 = arith.constant 0.000000e+00 : f32
    %7 = vector.broadcast %cst_5 : f32 to vector<16x256xf32>
    %8 = arith.maximumf %6, %7 : vector<16x256xf32>
    %9 = arith.truncf %8 : vector<16x256xf32> to vector<16x256xbf16>
    %c0_6 = arith.constant 0 : index
    %c0_7 = arith.constant 0 : index
    %10 = vector.load %arg4[%c0_6, %c0_7] : memref<256x256xbf16, #tpu.memory_space<vmem>>, vector<256x256xbf16>
    %cst_8 = arith.constant dense<0.000000e+00> : vector<16x256xf32>
    %11 = tpu.matmul %9, %10, %cst_8 {dimension_numbers = #tpu.dot_dimension_numbers<[1], [0], [0], [1], [0, 0, 1, 1], [], []>} : vector<16x256xbf16>, vector<256x256xbf16>, vector<16x256xf32> -> vector<16x256xf32>
    %c0_9 = arith.constant 0 : index
    %c0_10 = arith.constant 0 : index
    %12 = vector.load %arg5[%c0_9, %c0_10] : memref<1x256xf32, #tpu.memory_space<vmem>>, vector<1x256xf32>
    %13 = vector.broadcast %12 : vector<1x256xf32> to vector<16x256xf32>
    %14 = arith.addf %11, %13 : vector<16x256xf32>
    %cst_11 = arith.constant 0.000000e+00 : f32
    %15 = vector.broadcast %cst_11 : f32 to vector<16x256xf32>
    %16 = arith.maximumf %14, %15 : vector<16x256xf32>
    %17 = arith.truncf %16 : vector<16x256xf32> to vector<16x256xbf16>
    %c0_12 = arith.constant 0 : index
    %c0_13 = arith.constant 0 : index
    %18 = vector.load %arg6[%c0_12, %c0_13] : memref<256x128xbf16, #tpu.memory_space<vmem>>, vector<256x128xbf16>
    %cst_14 = arith.constant dense<0.000000e+00> : vector<16x128xf32>
    %19 = tpu.matmul %17, %18, %cst_14 {dimension_numbers = #tpu.dot_dimension_numbers<[1], [0], [0], [1], [0, 0, 1, 1], [], []>} : vector<16x256xbf16>, vector<256x128xbf16>, vector<16x128xf32> -> vector<16x128xf32>
    %c0_15 = arith.constant 0 : index
    %c0_16 = arith.constant 0 : index
    %20 = vector.load %arg7[%c0_15, %c0_16] : memref<1x128xf32, #tpu.memory_space<vmem>>, vector<1x128xf32>
    %21 = vector.broadcast %20 : vector<1x128xf32> to vector<16x128xf32>
    %22 = arith.addf %19, %21 : vector<16x128xf32>
    %23 = math.tanh %22 : vector<16x128xf32>
    %cst_17 = arith.constant 2.000000e+00 : f32
    %24 = vector.broadcast %cst_17 : f32 to vector<16x128xf32>
    %25 = arith.mulf %24, %23 : vector<16x128xf32>
    %26 = arith.truncf %25 : vector<16x128xf32> to vector<16x128xbf16>
    %c0_18 = arith.constant 0 : index
    %c0_19 = arith.constant 0 : index
    %27 = vector.load %arg8[%c0_18, %c0_19] : memref<16x128xbf16, #tpu.memory_space<vmem>>, vector<16x128xbf16>
    tpu.vector_store %arg8[%c0_18, %c0_19], %26 {strides = array<i32>} : memref<16x128xbf16, #tpu.memory_space<vmem>>, vector<16x128xbf16>,
    return
  }
  func.func @transform_0(%arg0: i32) -> (i32, i32) {
    %c0_i32 = arith.constant 0 : i32
    %c0_i32_0 = arith.constant 0 : i32
    return %arg0, %c0_i32 : i32, i32
  }
  func.func @transform_1(%arg0: i32) -> (i32, i32) {
    %c0_i32 = arith.constant 0 : i32
    %c0_i32_0 = arith.constant 0 : i32
    %c0_i32_1 = arith.constant 0 : i32
    return %c0_i32, %c0_i32_0 : i32, i32
  }
  func.func @transform_2(%arg0: i32) -> (i32, i32) {
    %c0_i32 = arith.constant 0 : i32
    %c0_i32_0 = arith.constant 0 : i32
    %c0_i32_1 = arith.constant 0 : i32
    return %c0_i32, %c0_i32_0 : i32, i32
  }
  func.func @transform_3(%arg0: i32) -> (i32, i32) {
    %c0_i32 = arith.constant 0 : i32
    %c0_i32_0 = arith.constant 0 : i32
    %c0_i32_1 = arith.constant 0 : i32
    return %c0_i32, %c0_i32_0 : i32, i32
  }
  func.func @transform_4(%arg0: i32) -> (i32, i32) {
    %c0_i32 = arith.constant 0 : i32
    %c0_i32_0 = arith.constant 0 : i32
    %c0_i32_1 = arith.constant 0 : i32
    return %c0_i32, %c0_i32_0 : i32, i32
  }
  func.func @transform_5(%arg0: i32) -> (i32, i32) {
    %c0_i32 = arith.constant 0 : i32
    %c0_i32_0 = arith.constant 0 : i32
    %c0_i32_1 = arith.constant 0 : i32
    return %c0_i32, %c0_i32_0 : i32, i32
  }
  func.func @transform_6(%arg0: i32) -> (i32, i32) {
    %c0_i32 = arith.constant 0 : i32
    %c0_i32_0 = arith.constant 0 : i32
    %c0_i32_1 = arith.constant 0 : i32
    return %c0_i32, %c0_i32_0 : i32, i32
  }
  func.func @transform_7(%arg0: i32) -> (i32, i32) {
    %c0_i32 = arith.constant 0 : i32
    %c0_i32_0 = arith.constant 0 : i32
    return %arg0, %c0_i32 : i32, i32
  }
}

</mosaic_0001>

<bundles_post_ra>
// kernel: tpu_custom_call.1
= control target key start
LH: loop header
LB: loop body
LE: loop exit
PB: predicated region body
PF: predicated region fallthrough
CT: control target
= control target key end

     0   :  { %12 = vsyncpa [#allocation3], 0  ;;  %s1140_s0 = inlined_call_operand.hbm [shape: f32[16,32], index: 0, kind: input, shape index: {}]   ;;  %s1141_s1 = inlined_call_operand.hbm [shape: bf16[32,256], index: 1, kind: input, shape index: {}]   ;;  %s1142_s2 = inlined_call_operand.hbm [shape: f32[1,256], index: 2, kind: input, shape index: {}]   ;;  %s1143_s3 = inlined_call_operand.hbm [shape: bf16[256,256], index: 3, kind: input, shape index: {}]   ;;  %s1144_s4 = inlined_call_operand.vmem [shape: f32[1,256], index: 4, kind: input, shape index: {}]   ;;  %s1145_s5 = inlined_call_operand.hbm [shape: bf16[256,128], index: 5, kind: input, shape index: {}]   ;;  %s1146_s6 = inlined_call_operand.vmem [shape: f32[1,128], index: 6, kind: input, shape index: {}]   ;;  %s1147_s7 = inlined_call_operand.hbm [shape: bf16[16,128], index: 7, kind: output, shape index: {}]  }
   0x1   :  { %13 = vsyncpa [#allocation6], 0 }
   0x2   :  { %14 = vsyncpa [#allocation9], 0 }
   0x3   :  { %15 = vsyncpa [#allocation4], 0  ;;  %s33_s26 = sshll.u32 %s1141_s1, 4  ;;  %s1058_s27 = smov [#allocation5]   ;;  %s34_s26 = int_to_ptr.hbm [resolvable:$true] %s33_s26 }
   0x4   :  { %s35_s28 = sshll.u32 %s1058_s27, 4  ;;  %s57_s8 = sshll.u32 %s1143_s3, 4  ;;  %s36_s28 = int_to_ptr.vmem [resolvable:$true] %s35_s28  ;;  %s58_s8 = int_to_ptr.hbm [resolvable:$true] %s57_s8 }
   0x5   :  { %s1059_s9 = smov 128   ;;  %s1060_s10 = smov 8  }
   0x6   :  { %41 = dma.hbm_to_vmem [thread:$0]  %s34_s26, 512, %s36_s28, [#allocation6], %s1059_s9, %s1059_s9, %s1060_s10  }
   0x7   :  { %s1061_s11 = smov [#allocation8]   ;;  %s20_s15 = sshll.u32 %s1140_s0, 4  ;;  %s21_s15 = int_to_ptr.hbm [resolvable:$true] %s20_s15 }
   0x8   :  { %s59_s12 = sshll.u32 %s1061_s11, 4  ;;  %s47_s17 = sshll.u32 %s1142_s2, 4  ;;  %s60_s12 = int_to_ptr.vmem [resolvable:$true] %s59_s12  ;;  %s48_s17 = int_to_ptr.hbm [resolvable:$true] %s47_s17 }
   0x9   :  { %65 = dma.hbm_to_vmem [thread:$0]  %s58_s8, 4096, %s60_s12, [#allocation9], %s1059_s9, %s1059_s9, %s1060_s10  }
   0xa   :  { %s1062_s18 = smov [#allocation2]   ;;  %s1063_s3 = smov [#allocation7]  }
   0xb   :  { %s22_s19 = sshll.u32 %s1062_s18, 4  ;;  %s49_s20 = sshll.u32 %s1063_s3, 4  ;;  %s23_s19 = int_to_ptr.vmem [resolvable:$true] %s22_s19  ;;  %s50_s20 = int_to_ptr.vmem [resolvable:$true] %s49_s20 }
   0xc   :  { %28 = dma.hbm_to_vmem [thread:$0]  %s21_s15, 256, %s23_s19, [#allocation3], %s1059_s9, %s1059_s9, %s1060_s10  }
   0xd   :  { %s72_s23 = sshll.u32 %s1145_s5, 4  ;;  %s1064_s0 = smov [#allocation10]   ;;  %s73_s23 = int_to_ptr.hbm [resolvable:$true] %s72_s23 }
   0xe   :  { %52 = dma.hbm_to_vmem [thread:$0]  %s48_s17, 32, %s50_s20, [#allocation6]  }
   0xf   :  { %s74_s24 = sshll.u32 %s1064_s0, 4  ;;  %s1065_s25 = smov 64   ;;  %s75_s24 = int_to_ptr.vmem [resolvable:$true] %s74_s24 }
  0x10   :  { %s1066_s26 = smov 4  }
  0x11   :  { %80 = dma.hbm_to_vmem [thread:$0]  %s73_s23, 2048, %s75_s24, [#allocation9], %s1065_s25, %s1065_s25, %s1066_s26  }
  0x12   :  { %1050 = dma.done.wait [#allocation3], 256  }
  0x13   :  { %1051 = vsyncadd [#allocation3], 4294967040 }
  0x14   :  { %1052 = dma.done.wait [#allocation6], 544  }
  0x15   :  { %1053 = vsyncadd [#allocation6], 4294966752 }
  0x16   :  { %1054 = dma.done.wait [#allocation9], 6144  }
  0x17   :  { %1055 = vsyncadd [#allocation9], 4294961152  ;;  %v634_v0 = vld [vmem:[#allocation5 + $0x10] sm:$0xf]  ;;  %v837_v1 = vld [vmem:[#allocation5 + $0x14] sm:$0xf0] }
  0x18   :  { %v836_v2 = vld [vmem:[#allocation5 + $0x14] sm:$0xf]  ;;  %v635_v3 = vor.u32 %v837_v1, %v634_v0  ;;  %v636_v4 = vld [vmem:[#allocation5 + $0x18] sm:$0xf0]  ;;  %v626_v5 = vld [vmem:[#allocation5] sm:$0xf] }
  0x19   :  { %v835_v6 = vld [vmem:[#allocation5 + $0x4] sm:$0xf0]  ;;  %v639_v7 = vor.u32 %v836_v2, %v636_v4  ;;  %v834_v8 = vld [vmem:[#allocation5 + $0x4] sm:$0xf]  ;;  %v628_v9 = vld [vmem:[#allocation5 + $0x8] sm:$0xf0] }
  0x1a   :  { %v104_v10 = vld [vmem:[#allocation2] sm:$0xff]  ;;  %147 = vmatpush.bf16.msra.mxu0 %v635_v3  ;;  %v627_v11 = vor.u32 %v835_v6, %v626_v5  ;;  %v105_v12 = vld [vmem:[#allocation2 + $0x8] sm:$0xff]  ;;  %vm137_vm0 = vcmask 261120   ;;  %v631_v15 = vor.u32 %v834_v8, %v628_v9  ;;  %v692_v27 = vld [vmem:[#allocation8 + $0x60] sm:$0xf]  ;;  %s1067_s28 = smov [#allocation11]  }
  0x1b   :  { %v700_v13 = vld [vmem:[#allocation8 + $0x70] sm:$0xf]  ;;  %v853_v14 = vld [vmem:[#allocation8 + $0x74] sm:$0xf0]  ;;  %161 = vmatpush.bf16.msra.mxu1 %v639_v7  ;;  %v852_v19 = vld [vmem:[#allocation8 + $0x74] sm:$0xf]  ;;  %v106_v24 = vpack.c.bf16 %v105_v12, %v104_v10 }
  0x1c   :  { %v701_v16 = vor.u32 %v853_v14, %v700_v13  ;;  %v764_v17 = vld [vmem:[#allocation8 + $0xf0] sm:$0xf]  ;;  %v869_v18 = vld [vmem:[#allocation8 + $0xf4] sm:$0xf0]  ;;  %v702_v21 = vld [vmem:[#allocation8 + $0x78] sm:$0xf0] }
  0x1d   :  { %v765_v20 = vor.u32 %v869_v18, %v764_v17  ;;  %v868_v22 = vld [vmem:[#allocation8 + $0xf4] sm:$0xf]  ;;  %v766_v23 = vld [vmem:[#allocation8 + $0xf8] sm:$0xf0]  ;;  %v705_v25 = vor.u32 %v852_v19, %v702_v21  ;;  %v851_v28 = vld [vmem:[#allocation8 + $0x64] sm:$0xf0] }
  0x1e   :  { %373 = vmatpush.bf16.msra.mxu2 %v701_v16  ;;  %v769_v26 = vor.u32 %v868_v22, %v766_v23  ;;  %v756_v29 = vld [vmem:[#allocation8 + $0xe0] sm:$0xf]  ;;  %148 = vmatpush.bf16.msra.mxu0 %v627_v11  ;;  %v693_v30 = vor.u32 %v851_v28, %v692_v27  ;;  %v867_v31 = vld [vmem:[#allocation8 + $0xe4] sm:$0xf0]  ;;  %v850_v32 = vld [vmem:[#allocation8 + $0x64] sm:$0xf] }
  0x1f   :  { %387 = vmatpush.bf16.msra.mxu3 %v765_v20  ;;  %v694_v33 = vld [vmem:[#allocation8 + $0x68] sm:$0xf0]  ;;  %162 = vmatpush.bf16.msra.mxu1 %v631_v15  ;;  %v757_v34 = vor.u32 %v867_v31, %v756_v29  ;;  %v866_v36 = vld [vmem:[#allocation8 + $0xe4] sm:$0xf]  ;;  %v684_v38 = vld [vmem:[#allocation8 + $0x50] sm:$0xf] }
  0x20   :  { %v697_v35 = vor.u32 %v850_v32, %v694_v33  ;;  %v758_v37 = vld [vmem:[#allocation8 + $0xe8] sm:$0xf0]  ;;  %v849_v40 = vld [vmem:[#allocation8 + $0x54] sm:$0xf0]  ;;  %v748_v41 = vld [vmem:[#allocation8 + $0xd0] sm:$0xf] }
  0x21   :  { %v761_v39 = vor.u32 %v866_v36, %v758_v37  ;;  %v865_v42 = vld [vmem:[#allocation8 + $0xd4] sm:$0xf0]  ;;  %640 = vmatmul.msk.bf16.vlgmr.msra.gmra.mxu0 %vm137_vm0, %v106_v24  ;;  %v685_v43 = vor.u32 %v849_v40, %v684_v38  ;;  %v848_v44 = vld [vmem:[#allocation8 + $0x54] sm:$0xf]  ;;  %v686_v45 = vld [vmem:[#allocation8 + $0x58] sm:$0xf0] }
  0x22   :  { %401 = vmatpush.bf16.msrb.mxu0 %v705_v25  ;;  %374 = vmatpush.bf16.msra.mxu2 %v693_v30  ;;  %v864_v46 = vld [vmem:[#allocation8 + $0xd4] sm:$0xf]  ;;  %v749_v47 = vor.u32 %v865_v42, %v748_v41  ;;  %v750_v48 = vld [vmem:[#allocation8 + $0xd8] sm:$0xf0]  ;;  %v676_v49 = vld [vmem:[#allocation8 + $0x40] sm:$0xf]  ;;  %v689_v51 = vor.u32 %v848_v44, %v686_v45 }
  0x23   :  { %415 = vmatpush.bf16.msrb.mxu1 %v769_v26  ;;  %388 = vmatpush.bf16.msra.mxu3 %v757_v34  ;;  %v847_v50 = vld [vmem:[#allocation8 + $0x44] sm:$0xf0]  ;;  %v740_v52 = vld [vmem:[#allocation8 + $0xc0] sm:$0xf]  ;;  %v753_v54 = vor.u32 %v864_v46, %v750_v48  ;;  %v846_v55 = vld [vmem:[#allocation8 + $0x44] sm:$0xf] }
  0x24   :  { %641 = vmatmul.msk.bf16.vlgmr.msra.gmra.mxu1 %vm137_vm0, %v106_v24  ;;  %v863_v53 = vld [vmem:[#allocation8 + $0xc4] sm:$0xf0]  ;;  %v678_v56 = vld [vmem:[#allocation8 + $0x48] sm:$0xf0]  ;;  %v677_v57 = vor.u32 %v847_v50, %v676_v49  ;;  %v862_v58 = vld [vmem:[#allocation8 + $0xc4] sm:$0xf] }
  0x25   :  { %v742_v59 = vld [vmem:[#allocation8 + $0xc8] sm:$0xf0]  ;;  %v741_v60 = vor.u32 %v863_v53, %v740_v52  ;;  %v681_v61 = vor.u32 %v846_v55, %v678_v56  ;;  %v668_v63 = vld [vmem:[#allocation8 + $0x30] sm:$0xf]  ;;  %v845_v0 = vld [vmem:[#allocation8 + $0x34] sm:$0xf0] }
  0x26   :  { %402 = vmatpush.bf16.msrb.mxu0 %v697_v35  ;;  %375 = vmatpush.bf16.msra.mxu2 %v685_v43  ;;  %v745_v62 = vor.u32 %v862_v58, %v742_v59  ;;  %v732_v1 = vld [vmem:[#allocation8 + $0xb0] sm:$0xf]  ;;  %v669_v2 = vor.u32 %v845_v0, %v668_v63  ;;  %v861_v3 = vld [vmem:[#allocation8 + $0xb4] sm:$0xf0]  ;;  %v844_v4 = vld [vmem:[#allocation8 + $0x34] sm:$0xf] }
  0x27   :  { %416 = vmatpush.bf16.msrb.mxu1 %v761_v39  ;;  %389 = vmatpush.bf16.msra.mxu3 %v749_v47  ;;  %v670_v5 = vld [vmem:[#allocation8 + $0x38] sm:$0xf0]  ;;  %v733_v6 = vor.u32 %v861_v3, %v732_v1  ;;  %v860_v8 = vld [vmem:[#allocation8 + $0xb4] sm:$0xf]  ;;  %v660_v11 = vld [vmem:[#allocation8 + $0x20] sm:$0xf] }
  0x28   :  { %v673_v7 = vor.u32 %v844_v4, %v670_v5  ;;  %v734_v9 = vld [vmem:[#allocation8 + $0xb8] sm:$0xf0]  ;;  %v843_v12 = vld [vmem:[#allocation8 + $0x24] sm:$0xf0]  ;;  %v724_v14 = vld [vmem:[#allocation8 + $0xa0] sm:$0xf] }
  0x29   :  { %v737_v10 = vor.u32 %v860_v8, %v734_v9  ;;  %v661_v13 = vor.u32 %v843_v12, %v660_v11  ;;  %v859_v15 = vld [vmem:[#allocation8 + $0xa4] sm:$0xf0]  ;;  %v842_v16 = vld [vmem:[#allocation8 + $0x24] sm:$0xf]  ;;  %v662_v18 = vld [vmem:[#allocation8 + $0x28] sm:$0xf0] }
  0x2a   :  { %403 = vmatpush.bf16.msrb.mxu0 %v689_v51  ;;  %376 = vmatpush.bf16.msra.mxu2 %v677_v57  ;;  %v725_v17 = vor.u32 %v859_v15, %v724_v14  ;;  %v858_v19 = vld [vmem:[#allocation8 + $0xa4] sm:$0xf]  ;;  %v726_v20 = vld [vmem:[#allocation8 + $0xa8] sm:$0xf0]  ;;  %v665_v21 = vor.u32 %v842_v16, %v662_v18  ;;  %v652_v23 = vld [vmem:[#allocation8 + $0x10] sm:$0xf] }
  0x2b   :  { %417 = vmatpush.bf16.msrb.mxu1 %v753_v54  ;;  %390 = vmatpush.bf16.msra.mxu3 %v741_v60  ;;  %v729_v22 = vor.u32 %v858_v19, %v726_v20  ;;  %v841_v24 = vld [vmem:[#allocation8 + $0x14] sm:$0xf0]  ;;  %v716_v25 = vld [vmem:[#allocation8 + $0x90] sm:$0xf]  ;;  %v840_v28 = vld [vmem:[#allocation8 + $0x14] sm:$0xf] }
  0x2c   :  { %v653_v26 = vor.u32 %v841_v24, %v652_v23  ;;  %v857_v27 = vld [vmem:[#allocation8 + $0x94] sm:$0xf0]  ;;  %v654_v29 = vld [vmem:[#allocation8 + $0x18] sm:$0xf0]  ;;  %v856_v32 = vld [vmem:[#allocation8 + $0x94] sm:$0xf] }
  0x2d   :  { %v717_v30 = vor.u32 %v857_v27, %v716_v25  ;;  %v657_v31 = vor.u32 %v840_v28, %v654_v29  ;;  %v718_v33 = vld [vmem:[#allocation8 + $0x98] sm:$0xf0]  ;;  %v644_v35 = vld [vmem:[#allocation8] sm:$0xf]  ;;  %v839_v36 = vld [vmem:[#allocation8 + $0x4] sm:$0xf0] }
  0x2e   :  { %404 = vmatpush.bf16.msrb.mxu0 %v681_v61  ;;  %377 = vmatpush.bf16.msra.mxu2 %v669_v2  ;;  %v721_v34 = vor.u32 %v856_v32, %v718_v33  ;;  %v708_v37 = vld [vmem:[#allocation8 + $0x80] sm:$0xf]  ;;  %v645_v38 = vor.u32 %v839_v36, %v644_v35  ;;  %v855_v39 = vld [vmem:[#allocation8 + $0x84] sm:$0xf0]  ;;  %v838_v40 = vld [vmem:[#allocation8 + $0x4] sm:$0xf] }
  0x2f   :  { %418 = vmatpush.bf16.msrb.mxu1 %v745_v62  ;;  %391 = vmatpush.bf16.msra.mxu3 %v733_v6  ;;  %v646_v41 = vld [vmem:[#allocation8 + $0x8] sm:$0xf0]  ;;  %v709_v42 = vor.u32 %v855_v39, %v708_v37  ;;  %v854_v44 = vld [vmem:[#allocation8 + $0x84] sm:$0xf]  ;;  %v885_v47 = vld [vmem:[#allocation10 + $0x78] sm:$0xff]  ;;  %s607_s29 = sshll.u32 %s1067_s28, 4  ;;  %s608_s29 = int_to_ptr.vmem [resolvable:$true] %s607_s29 }
  0x30   :  { %v649_v43 = vor.u32 %v838_v40, %v646_v41  ;;  %v710_v45 = vld [vmem:[#allocation8 + $0x88] sm:$0xf0]  ;;  %v877_v48 = vld [vmem:[#allocation10 + $0x38] sm:$0xff]  ;;  %v884_v49 = vld [vmem:[#allocation10 + $0x70] sm:$0xff]  ;;  %s609_s9 = sshll.u32 %s1147_s7, 4  ;;  %s610_s9 = int_to_ptr.hbm [resolvable:$true] %s609_s9 }
  0x31   :  { %v713_v46 = vor.u32 %v854_v44, %v710_v45  ;;  %v876_v50 = vld [vmem:[#allocation10 + $0x30] sm:$0xff]  ;;  %v883_v51 = vld [vmem:[#allocation10 + $0x68] sm:$0xff]  ;;  %v882_v52 = vld [vmem:[#allocation10 + $0x60] sm:$0xff] }
  0x32   :  { %405 = vmatpush.bf16.msrb.mxu0 %v673_v7  ;;  %378 = vmatpush.bf16.msra.mxu2 %v661_v13  ;;  %v111_v53 = vld [vmem:[#allocation7] sm:$0x3]  ;;  %v875_v6 = vld [vmem:[#allocation10 + $0x28] sm:$0xff]  ;;  %v874_v8 = vld [vmem:[#allocation10 + $0x20] sm:$0xff] }
  0x33   :  { %419 = vmatpush.bf16.msrb.mxu1 %v737_v10  ;;  %392 = vmatpush.bf16.msra.mxu3 %v725_v17  ;;  %v113_v56 = vperm.slane %v111_v53, 0  ;;  %v114_v57 = vperm.slane %v111_v53, 1  ;;  %v881_v7 = vld [vmem:[#allocation10 + $0x58] sm:$0xff]  ;;  %v880_v9 = vld [vmem:[#allocation10 + $0x50] sm:$0xff]  ;;  %v879_v11 = vld [vmem:[#allocation10 + $0x48] sm:$0xff] }
  0x34   :  { %v873_v10 = vld [vmem:[#allocation10 + $0x18] sm:$0xff]  ;;  %v872_v12 = vld [vmem:[#allocation10 + $0x10] sm:$0xff]  ;;  %v878_v13 = vld [vmem:[#allocation10 + $0x40] sm:$0xff] }
  0x35   :  { %v871_v14 = vld [vmem:[#allocation10 + $0x8] sm:$0xff]  ;;  %v870_v15 = vld [vmem:[#allocation10] sm:$0xff] }
  0x36   :  { %406 = vmatpush.bf16.msrb.mxu0 %v665_v21  ;;  %379 = vmatpush.bf16.msra.mxu2 %v653_v26  ;;  %v207_v16 = vld [vmem:[%s1144_s4] sm:$0x3] }
  0x37   :  { %420 = vmatpush.bf16.msrb.mxu1 %v729_v22  ;;  %393 = vmatpush.bf16.msra.mxu3 %v717_v30  ;;  %v210_v18 = vperm.slane %v207_v16, 1  ;;  %v209_v22 = vperm.slane %v207_v16, 0  ;;  %v901_v41 = vld [vmem:[%s1146_s6] ss:$0 sm:$0xff] }
  0x3a   :  { %407 = vmatpush.bf16.msrb.mxu0 %v657_v31  ;;  %380 = vmatpush.bf16.msra.mxu2 %v645_v38 }
  0x3b   :  { %421 = vmatpush.bf16.msrb.mxu1 %v721_v34  ;;  %394 = vmatpush.bf16.msra.mxu3 %v709_v42 }
  0x3e   :  { %408 = vmatpush.bf16.msrb.mxu0 %v649_v43  ;;  %567 = vmatpush.bf16.msrb.mxu2 %v877_v48 }
  0x3f   :  { %422 = vmatpush.bf16.msrb.mxu1 %v713_v46  ;;  %581 = vmatpush.bf16.msrb.mxu3 %v885_v47 }
  0x42   :  { %568 = vmatpush.bf16.msrb.mxu2 %v876_v50 }
  0x43   :  { %582 = vmatpush.bf16.msrb.mxu3 %v884_v49 }
  0x46   :  { %569 = vmatpush.bf16.msrb.mxu2 %v875_v6 }
  0x47   :  { %583 = vmatpush.bf16.msrb.mxu3 %v883_v51 }
  0x4a   :  { %570 = vmatpush.bf16.msrb.mxu2 %v874_v8 }
  0x4b   :  { %584 = vmatpush.bf16.msrb.mxu3 %v882_v52 }
  0x4e   :  { %571 = vmatpush.bf16.msrb.mxu2 %v873_v10 }
  0x4f   :  { %585 = vmatpush.bf16.msrb.mxu3 %v881_v7 }
  0x52   :  { %572 = vmatpush.bf16.msrb.mxu2 %v872_v12 }
  0x53   :  { %586 = vmatpush.bf16.msrb.mxu3 %v880_v9 }
  0x56   :  { %573 = vmatpush.bf16.msrb.mxu2 %v871_v14 }
  0x57   :  { %587 = vmatpush.bf16.msrb.mxu3 %v879_v11 }
  0x5a   :  { %574 = vmatpush.bf16.msrb.mxu2 %v870_v15 }
  0x5b   :  { %588 = vmatpush.bf16.msrb.mxu3 %v878_v13 }
  0x9e   :  { %v150_v54 = vpop.f32.mrf.mxu0 }
  0x9f   :  { %v151_v58 = vadd.f32 %v150_v54, %v113_v56 }
  0xa1   :  { %v164_v55 = vpop.f32.mrf.mxu1  ;;  %v169_v0 = vmax.f32 %v151_v58, 0.0 }
  0xa2   :  { %v165_v59 = vadd.f32 %v164_v55, %v114_v57 }
  0xa4   :  { %v170_v2 = vmax.f32 %v165_v59, 0.0 }
  0xa6   :  { %v152_v60 = vpop.f32.mrf.mxu0 }
  0xa7   :  { %v153_v61 = vadd.f32 %v152_v60, %v113_v56 }
  0xa9   :  { %v166_v62 = vpop.f32.mrf.mxu1  ;;  %v171_v1 = vmax.f32 %v153_v61, 0.0 }
  0xaa   :  { %v167_v63 = vadd.f32 %v166_v62, %v114_v57 }
  0xab   :  { %v173_v4 = vpack.c.bf16 %v171_v1, %v169_v0 }
  0xac   :  { %v172_v3 = vmax.f32 %v167_v63, 0.0 }
  0xad   :  { %381 = vmatmul.bf16.vlgmr.msra.gmra.mxu2 %v173_v4  ;;  %409 = vmatmul.bf16.vlgmr.msrb.gmra.mxu0 %v173_v4 }
  0xae   :  { %v174_v5 = vpack.c.bf16 %v172_v3, %v170_v2 }
  0xb0   :  { %395 = vmatmul.bf16.vlgmr.msra.gmra.mxu3 %v174_v5  ;;  %423 = vmatmul.bf16.vlgmr.msrb.gmra.mxu1 %v174_v5 }
 0x12a   :  { %v410_v17 = vpop.f32.mrf.mxu0 }
 0x12b   :  { %v411_v20 = vadd.f32 %v410_v17, %v210_v18 }
 0x12d   :  { %v424_v19 = vpop.f32.mrf.mxu1 }
 0x12e   :  { %v425_v25 = vadd.f32 %v424_v19, %v411_v20 }
 0x130   :  { %v382_v21 = vpop.f32.mrf.mxu2  ;;  %v430_v30 = vmax.f32 %v425_v25, 0.0 }
 0x131   :  { %v383_v28 = vadd.f32 %v382_v21, %v209_v22 }
 0x132   :  { %v412_v24 = vpop.f32.mrf.mxu0 }
 0x133   :  { %v396_v23 = vpop.f32.mrf.mxu3  ;;  %v413_v26 = vadd.f32 %v412_v24, %v210_v18 }
 0x134   :  { %v397_v33 = vadd.f32 %v396_v23, %v383_v28 }
 0x135   :  { %v426_v27 = vpop.f32.mrf.mxu1 }
 0x136   :  { %v427_v29 = vadd.f32 %v426_v27, %v413_v26  ;;  %v429_v38 = vmax.f32 %v397_v33, 0.0 }
 0x138   :  { %v432_v31 = vmax.f32 %v427_v29, 0.0  ;;  %v384_v32 = vpop.f32.mrf.mxu2 }
 0x139   :  { %v385_v35 = vadd.f32 %v384_v32, %v209_v22 }
 0x13a   :  { %v434_v34 = vpack.c.bf16 %v432_v31, %v430_v30 }
 0x13b   :  { %v398_v36 = vpop.f32.mrf.mxu3 }
 0x13c   :  { %v399_v37 = vadd.f32 %v398_v36, %v385_v35  ;;  %589 = vmatmul.bf16.vlgmr.msrb.gmra.mxu3 %v434_v34 }
 0x13e   :  { %v431_v39 = vmax.f32 %v399_v37, 0.0 }
 0x140   :  { %v433_v40 = vpack.c.bf16 %v431_v39, %v429_v38 }
 0x142   :  { %575 = vmatmul.bf16.vlgmr.msrb.gmra.mxu2 %v433_v40 }
 0x1bf   :  { %v590_v42 = vpop.f32.mrf.mxu3 }
 0x1c5   :  { %v576_v43 = vpop.f32.mrf.mxu2 }
 0x1c6   :  { %v577_v44 = vadd.f32 %v901_v41, %v576_v43 }
 0x1c7   :  { %v592_v48 = vpop.f32.mrf.mxu3 }
 0x1c8   :  { %v591_v45 = vadd.f32 %v590_v42, %v577_v44 }
 0x1ca   :  { %902 = vtanh.f32 %v591_v45 }
 0x1cd   :  { %v578_v46 = vpop.f32.mrf.mxu2 }
 0x1ce   :  { %v579_v47 = vadd.f32 %v901_v41, %v578_v46 }
 0x1d0   :  { %v593_v49 = vadd.f32 %v592_v48, %v579_v47  ;;  %v903_v50 = vpop.eup %902 }
 0x1d1   :  { %v597_v52 = vmul.f32 2.0, %v903_v50 }
 0x1d2   :  { %904 = vtanh.f32 %v593_v49 }
 0x1d8   :  { %v905_v51 = vpop.eup %904 }
 0x1d9   :  { %v598_v53 = vmul.f32 2.0, %v905_v51 }
 0x1db   :  { %v889_v54 = vpack.c.bf16 %v598_v53, %v597_v52 }
 0x1dd   :  { %890 = vst [vmem:[#allocation11] sm:$0xff] %v889_v54  }
 0x1de   :  { %615 = dma.vmem_to_hbm [thread:$0]  %s608_s29, 128, %s610_s9, [#allocation4], %s1065_s25, %s1065_s25, %s1066_s26  }
 0x1df   :  { %1056 = dma.done.wait [#allocation4], 128  }
 0x1e0   :  { %1057 = vsyncadd [#allocation4], 4294967168 }
 0x1e1   :  { %620 = vsyncpa [#allocation3], 1 }
 0x1e2   :  { %621 = vsyncpa [#allocation6], 1 }
 0x1e3   :  { %622 = vsyncpa [#allocation9], 1 }
 0x1e4   :  { %623 = vsyncpa [#allocation4], 1 }

</bundles_post_ra>
